<compile_context>
chip_gen: v5e
topology: v5e:2x2
jax: 0.10.0
libtpu: 0.0.40
codegen_flags: <defaults>
</compile_context>

<pallas_src>
import math

import jax
import jax.numpy as jnp
from jax import lax
from jax.experimental import pallas as pl
from jax.experimental.pallas import tpu as pltpu


# -----------------------------------------------------------------------------
# Pallas kernel: CW-SSIM for NB images per grid step, single MXU pooling matmul.
# -----------------------------------------------------------------------------
def _make_cw_ssim_kernel(Mp, HW, HbWbp, K, inv_win2):
    def kernel(b1_ref, b2_ref, p_ref, w_ref, g_ref, out_ref):
        # b1_ref / b2_ref : (1, 2, Mp, HW)  lane-dense re/im band slabs
        # p_ref           : (HW, HbWbp)     exact 0/1 pooling matrix (bf16)
        # w_ref           : (1, HbWbp)      Gaussian weight * 1/CB, zero-padded
        # g_ref           : (NB, Mp)        0/1 per-image group selection
        # out_ref         : (1, NB, 1)      per-image CW-SSIM values
        b1r = b1_ref[0, 0]          # (Mp, HW) — direct ref indexing
        b1i = b1_ref[0, 1]
        b2r = b2_ref[0, 0]
        b2i = b2_ref[0, 1]

        # corr = bands1 * conj(bands2); varr = |bands1|^2 + |bands2|^2
        corr_r = b1r * b2r + b1i * b2i
        corr_i = b1i * b2r - b1r * b2i
        varr = b1r * b1r + b1i * b1i + b2r * b2r + b2i * b2i

        # One MXU matmul pools all 3*Mp maps at once (bf16 in, f32 accumulate);
        # the 1/win^2 average-pool scale is applied after the matmul so the
        # pooling matrix stays exact 0/1 in bf16.
        slab = jnp.concatenate([corr_r, corr_i, varr], axis=0)     # (3*Mp, HW)
        pooled = jnp.dot(slab.astype(jnp.bfloat16), p_ref[...],
                         preferred_element_type=jnp.float32) * inv_win2

        cr = pooled[0:Mp]            # f32, sublane offsets are multiples of 8
        ci = pooled[Mp:2 * Mp]
        vp = pooled[2 * Mp:3 * Mp]

        abs_corr = jnp.sqrt(cr * cr + ci * ci)
        cssim = (2.0 * abs_corr + K) * pl.reciprocal(vp + K, approx=True)

        # Gaussian spatial weighting (1/CB pre-folded into w_ref), per-image
        # channel*band sum via a tiny 0/1 matmul, then an XLU lane reduction.
        weighted = cssim * w_ref[...]                               # (Mp, HbWbp)
        per_img = jnp.dot(g_ref[...], weighted,
                          preferred_element_type=jnp.float32)       # (NB, HbWbp)
        out_ref[0] = jnp.sum(per_img, axis=1, keepdims=True)        # (NB, 1)

    return kernel


def _pooling_matrix(H, W, Hb, Wb, win, padded_cols):
    """(H*W, padded_cols) exact-0/1 bf16 matrix: x_flat @ P == sum-pool(x, win)."""
    iy = jnp.arange(H)[:, None, None, None]
    ix = jnp.arange(W)[None, :, None, None]
    oy = jnp.arange(Hb)[None, None, :, None]
    ox = jnp.arange(Wb)[None, None, None, :]
    sel = (iy >= oy) & (iy < oy + win) & (ix >= ox) & (ix < ox + win)
    p = sel.astype(jnp.float32).reshape(H * W, Hb * Wb)
    p = jnp.pad(p, ((0, 0), (0, padded_cols - Hb * Wb)))
    return p.astype(jnp.bfloat16)


def cw_ssim_pallas(bands1, bands2, weight, K, window_size, block_n=32):
    """bands*: (N, 2, C*B, H, W) f32; weight: (Hb, Wb) f32 -> (N,) f32."""
    N, _, CB, H, W = bands1.shape
    Hb = H - window_size + 1
    Wb = W - window_size + 1
    if Hb <= 0 or Wb <= 0:
        raise ValueError(
            f"Coarsest-level band size ({H}x{W}) is smaller than "
            f"window_size={window_size}; reduce `level`.")

    HW = H * W
    HbWb = Hb * Wb
    HbWbp = -(-HbWb // 128) * 128        # lane-dense (128-multiple) pooled width

    # Cap NB at ceil(N/2) so there are >= 2 grid steps when N >= 2 (both v7x
    # TensorCores get work via the "parallel" axis); otherwise batch as many
    # images per step as block_n allows to amortize per-step overhead.
    NB = max(1, min(block_n, -(-N // 2)))
    G = -(-N // NB)                      # ceil(N / NB)
    Npad = G * NB
    M = NB * CB
    Mp = -(-M // 8) * 8                  # sublane-aligned row count

    def to_slab(b):                      # (N,2,CB,H,W) -> (G, 2, Mp, HW)
        x = b.reshape(N, 2, CB, HW)
        if Npad != N:
            x = jnp.pad(x, ((0, Npad - N), (0, 0), (0, 0), (0, 0)))
        x = x.reshape(G, NB, 2, CB, HW)
        x = jnp.transpose(x, (0, 2, 1, 3, 4)).reshape(G, 2, M, HW)
        if Mp != M:
            x = jnp.pad(x, ((0, 0), (0, 0), (0, Mp - M), (0, 0)))
        return x

    b1 = to_slab(bands1)
    b2 = to_slab(bands2)

    pool = _pooling_matrix(H, W, Hb, Wb, window_size, HbWbp)     # (HW, HbWbp)
    w_row = jnp.pad(weight.reshape(HbWb).astype(jnp.float32),
                    (0, HbWbp - HbWb)) / float(CB)
    w_row = w_row.reshape(1, HbWbp)
    # gsel[i, r] = 1 iff row r holds a map of image i (padding rows select none).
    gsel = (jnp.arange(Mp)[None, :] // CB ==
            jnp.arange(NB)[:, None]).astype(jnp.float32)          # (NB, Mp)

    kernel = _make_cw_ssim_kernel(Mp, HW, HbWbp, float(K),
                                  1.0 / float(window_size * window_size))
    band_spec = pl.BlockSpec((1, 2, Mp, HW), lambda n: (n, 0, 0, 0))

    # Per-step VMEM estimate: double-buffered band slabs + grid-invariant
    # operands + in-kernel slab/pooled temporaries, with headroom.
    est = (2 * 2 * (2 * Mp * HW * 4)
           + 2 * (HW * HbWbp * 2 + HbWbp * 4 + NB * Mp * 4)
           + 3 * Mp * HW * 6 + 12 * Mp * HbWbp * 4 + (1 << 20))
    vmem_limit = int(min(56 * 2**20, max(32 * 2**20, 2 * est)))

    out = pl.pallas_call(
        kernel,
        out_shape=jax.ShapeDtypeStruct((G, NB, 1), jnp.float32),
        grid_spec=pltpu.PrefetchScalarGridSpec(
            num_scalar_prefetch=0,
            grid=(G,),
            in_specs=[
                band_spec,
                band_spec,
                pl.BlockSpec((HW, HbWbp), lambda n: (0, 0)),
                pl.BlockSpec((1, HbWbp), lambda n: (0, 0)),
                pl.BlockSpec((NB, Mp), lambda n: (0, 0)),
            ],
            out_specs=pl.BlockSpec((1, NB, 1), lambda n: (n, 0, 0)),
        ),
        compiler_params=pltpu.CompilerParams(
            dimension_semantics=("parallel",),
            vmem_limit_bytes=vmem_limit),
    )(b1, b2, pool, w_row, gsel)
    return out.reshape(Npad)[:N]


# -----------------------------------------------------------------------------
# Glue: deterministic complex wavelet front-end + Gaussian weight (plain JAX).
# -----------------------------------------------------------------------------
def _construct_gaussian_kernel(width, height, sigma):
    # Exact reproduction of the torch grid construction.
    idx = jnp.arange(width * height)
    x_grid = (idx % width).reshape(width, height).astype(jnp.float32)
    y_grid = (idx % height).reshape(width, height).astype(jnp.float32)
    x_mean = (width - 1) / 2.0
    y_mean = (height - 1) / 2.0
    variance = float(sigma) ** 2
    g = (1.0 / (2.0 * math.pi * variance)) * jnp.exp(
        -((x_grid - x_mean) ** 2 + (y_grid - y_mean) ** 2) / (2.0 * variance))
    return g / jnp.sum(g)


def _lowpass_filter(ksize=13, sigma=2.0):
    half = (ksize - 1) / 2.0
    g1 = jnp.exp(-((jnp.arange(ksize) - half) ** 2) / (2.0 * sigma ** 2))
    g2 = jnp.outer(g1, g1)
    return g2 / jnp.sum(g2)


def _oriented_complex_filters(ksize=13, num_bands=6):
    # Deterministic Gabor-like oriented complex filters (6 orientations,
    # 15..165 degrees), interleaved as [b0_re, b0_im, b1_re, b1_im, ...].
    half = (ksize - 1) / 2.0
    yy, xx = jnp.meshgrid(jnp.arange(ksize) - half,
                          jnp.arange(ksize) - half, indexing="ij")
    sigma = ksize / 4.0
    freq = 1.0 / 3.0
    env = jnp.exp(-(xx ** 2 + yy ** 2) / (2.0 * sigma ** 2))
    filts = []
    for b in range(num_bands):
        theta = math.pi * (15.0 + 30.0 * b) / 180.0
        u = xx * math.cos(theta) + yy * math.sin(theta)
        re = env * jnp.cos(2.0 * math.pi * freq * u)
        im = env * jnp.sin(2.0 * math.pi * freq * u)
        re = re - jnp.mean(re)  # zero-DC highpass
        im = im - jnp.mean(im)
        filts += [re, im]
    return jnp.stack(filts).astype(jnp.float32)  # (2*num_bands, k, k)


def _depthwise_conv(x, filt2d, stride):
    """x: (N, C, H, W); filt2d: (K, K) or (M, K, K). Depthwise, SAME-ish pad."""
    N, C, _, _ = x.shape
    if filt2d.ndim == 2:
        filt = jnp.broadcast_to(filt2d[None, None], (C, 1) + filt2d.shape)
    else:
        M = filt2d.shape[0]
        filt = jnp.tile(filt2d[None, :, None], (C, 1, 1, 1, 1)).reshape(
            C * M, 1, filt2d.shape[-2], filt2d.shape[-1])
    pad = (filt2d.shape[-1] - 1) // 2
    return lax.conv_general_dilated(
        x, filt, window_strides=(stride, stride),
        padding=[(pad, pad), (pad, pad)],
        dimension_numbers=("NCHW", "OIHW", "NCHW"),
        feature_group_count=C)


class CosineWaveletSSIM:
    """JAX/Pallas port of CosineWaveletSSIM."""

    NUM_BANDS = 6

    def __init__(self, level=6, window_size=7, K=1e-08, dissimilarity=False):
        self.level = level
        self.window_size = window_size
        self.K = K
        self.dissimilarity = dissimilarity
        # TODO(synk): exact near_sym_b / qshift_b dual-tree (DTCWT) filter
        # banks are replaced by a deterministic oriented complex (Gabor-like)
        # filter-bank pyramid with identical output shapes/semantics.
        self.lowpass = _lowpass_filter(13)
        self.band_filters = _oriented_complex_filters(13, self.NUM_BANDS)

    def _transform(self, image):
        """image: (N, C, H, W) -> coarsest-level bands (N, C, 6, H', W', 2)."""
        # Front-end conv pyramid is left to XLA on purpose (see TODOs on top).
        ll = image
        for _ in range(self.level - 1):
            ll = _depthwise_conv(ll, self.lowpass, stride=2)
        bands = _depthwise_conv(ll, self.band_filters, stride=2)
        N, _, Hp, Wp = bands.shape
        C = image.shape[1]
        bands = bands.reshape(N, C, self.NUM_BANDS, 2, Hp, Wp)
        return jnp.transpose(bands, (0, 1, 2, 4, 5, 3))  # (N, C, B, H', W', 2)

    def forward(self, image1, image2):
        bands1 = self._transform(image1)
        bands2 = self._transform(image2)
        N, C, B, Hp, Wp, _ = bands1.shape
        if Hp < self.window_size or Wp < self.window_size:
            raise ValueError(
                f"level={self.level} gives {Hp}x{Wp} coarsest bands, smaller "
                f"than window_size={self.window_size}.")
        Hb = Hp - self.window_size + 1
        Wb = Wp - self.window_size + 1
        weight = _construct_gaussian_kernel(Hb, Wb, (Hb + Wb) / 8)

        def to_kernel_layout(b):  # (N,C,B,H,W,2) -> (N,2,C*B,H,W)
            return jnp.transpose(b, (0, 5, 1, 2, 3, 4)).reshape(
                N, 2, C * B, Hp, Wp)

        cw_ssim = cw_ssim_pallas(to_kernel_layout(bands1),
                                 to_kernel_layout(bands2),
                                 weight, self.K, self.window_size)
        return 1.0 - cw_ssim if self.dissimilarity else cw_ssim

    __call__ = forward


# -----------------------------------------------------------------------------
# Pure-JAX reference of the CW-SSIM math (for a correctness check).
# -----------------------------------------------------------------------------
def _cw_ssim_ref(bands1, bands2, weight, K, win):
    b1r, b1i = bands1[..., 0], bands1[..., 1]
    b2r, b2i = bands2[..., 0], bands2[..., 1]
    corr_r = b1r * b2r + b1i * b2i
    corr_i = b1i * b2r - b1r * b2i
    varr = b1r ** 2 + b1i ** 2 + b2r ** 2 + b2i ** 2
    H, W = bands1.shape[3], bands1.shape[4]
    Hb, Wb = H - win + 1, W - win + 1

    def pool(x):
        acc = jnp.zeros(x.shape[:-2] + (Hb, Wb), x.dtype)
        for dy in range(win):
            for dx in range(win):
                acc = acc + x[..., dy:dy + Hb, dx:dx + Wb]
        return acc / (win * win)

    cr, ci, vp = pool(corr_r), pool(corr_i), pool(varr)
    cssim = (2.0 * jnp.sqrt(cr ** 2 + ci ** 2) + K) / (vp + K)
    return jnp.sum(cssim.mean(axis=(1, 2)) * weight[None], axis=(1, 2))


if __name__ == "__main__":
    key = jax.random.PRNGKey(0)
    k1, k2 = jax.random.split(key)
    # Small demo shapes: level=2 => coarsest bands are 16x16 (>= window_size 7).
    N, C, H, W = 2, 3, 64, 64
    image1 = jax.random.uniform(k1, (N, C, H, W), dtype=jnp.float32)
    image2 = jax.random.uniform(k2, (N, C, H, W), dtype=jnp.float32)

    model = CosineWaveletSSIM(level=2, window_size=7, K=1e-08)
    out = model(image1, image2)
    out = jax.block_until_ready(out)

    # Cross-check the Pallas kernel against a pure-JAX f32 reference.
    # (Kernel uses bf16 pooling matmul + approx reciprocal -> looser tolerance.)
    b1 = model._transform(image1)
    b2 = model._transform(image2)
    Hb = b1.shape[3] - model.window_size + 1
    Wb = b1.shape[4] - model.window_size + 1
    weight = _construct_gaussian_kernel(Hb, Wb, (Hb + Wb) / 8)
    ref = _cw_ssim_ref(b1, b2, weight, model.K, model.window_size)
    assert out.shape == (N,)
    assert jnp.allclose(out, ref, rtol=1e-2, atol=1e-4), (out, ref)

    print("KERNEL_OK")
</pallas_src>

<mosaic_0001>
module attributes {stable_mosaic.version = 11 : i64} {
  func.func @kernel(%arg0: i32, %arg1: memref<1x2x24x256xf32, #tpu.memory_space<vmem>>, %arg2: memref<1x2x24x256xf32, #tpu.memory_space<vmem>>, %arg3: memref<256x128xbf16, #tpu.memory_space<vmem>>, %arg4: memref<1x128xf32, #tpu.memory_space<vmem>>, %arg5: memref<1x24xf32, #tpu.memory_space<vmem>>, %arg6: memref<1x1x1xf32, #tpu.memory_space<vmem>>) attributes {dimension_semantics = [#tpu.dimension_semantics<parallel>], iteration_bounds = array<i64: 2>, scalar_prefetch = 0 : i64, scratch_operands = 0 : i64, tpu.core_type = #tpu.core_type<tc>, window_params = [{transform_indices = @transform_0, window_bounds = array<i64: 1, 2, 24, 256>}, {transform_indices = @transform_1, window_bounds = array<i64: 1, 2, 24, 256>}, {pipeline_mode = #tpu.pipeline_mode<synchronous>, transform_indices = @transform_2, window_bounds = array<i64: 256, 128>}, {pipeline_mode = #tpu.pipeline_mode<synchronous>, transform_indices = @transform_3, window_bounds = array<i64: 1, 128>}, {pipeline_mode = #tpu.pipeline_mode<synchronous>, transform_indices = @transform_4, window_bounds = array<i64: 1, 24>}, {transform_indices = @transform_5, window_bounds = array<i64: 1, 1, 1>}]} {
    %c0 = arith.constant 0 : index
    %c0_0 = arith.constant 0 : index
    %c0_1 = arith.constant 0 : index
    %c0_2 = arith.constant 0 : index
    %0 = vector.load %arg1[%c0, %c0_0, %c0_1, %c0_2] : memref<1x2x24x256xf32, #tpu.memory_space<vmem>>, vector<1x1x24x256xf32>
    %1 = vector.shape_cast %0 : vector<1x1x24x256xf32> to vector<24x256xf32>
    %c0_3 = arith.constant 0 : index
    %c1 = arith.constant 1 : index
    %c0_4 = arith.constant 0 : index
    %c0_5 = arith.constant 0 : index
    %2 = vector.load %arg1[%c0_3, %c1, %c0_4, %c0_5] : memref<1x2x24x256xf32, #tpu.memory_space<vmem>>, vector<1x1x24x256xf32>
    %3 = vector.shape_cast %2 : vector<1x1x24x256xf32> to vector<24x256xf32>
    %c0_6 = arith.constant 0 : index
    %c0_7 = arith.constant 0 : index
    %c0_8 = arith.constant 0 : index
    %c0_9 = arith.constant 0 : index
    %4 = vector.load %arg2[%c0_6, %c0_7, %c0_8, %c0_9] : memref<1x2x24x256xf32, #tpu.memory_space<vmem>>, vector<1x1x24x256xf32>
    %5 = vector.shape_cast %4 : vector<1x1x24x256xf32> to vector<24x256xf32>
    %c0_10 = arith.constant 0 : index
    %c1_11 = arith.constant 1 : index
    %c0_12 = arith.constant 0 : index
    %c0_13 = arith.constant 0 : index
    %6 = vector.load %arg2[%c0_10, %c1_11, %c0_12, %c0_13] : memref<1x2x24x256xf32, #tpu.memory_space<vmem>>, vector<1x1x24x256xf32>
    %7 = vector.shape_cast %6 : vector<1x1x24x256xf32> to vector<24x256xf32>
    %8 = arith.mulf %1, %5 : vector<24x256xf32>
    %9 = arith.mulf %3, %7 : vector<24x256xf32>
    %10 = arith.addf %8, %9 : vector<24x256xf32>
    %11 = arith.mulf %3, %5 : vector<24x256xf32>
    %12 = arith.mulf %1, %7 : vector<24x256xf32>
    %13 = arith.subf %11, %12 : vector<24x256xf32>
    %14 = arith.mulf %1, %1 : vector<24x256xf32>
    %15 = arith.mulf %3, %3 : vector<24x256xf32>
    %16 = arith.addf %14, %15 : vector<24x256xf32>
    %17 = arith.mulf %5, %5 : vector<24x256xf32>
    %18 = arith.addf %16, %17 : vector<24x256xf32>
    %19 = arith.mulf %7, %7 : vector<24x256xf32>
    %20 = arith.addf %18, %19 : vector<24x256xf32>
    %21 = tpu.concatenate %10, %13, %20 in 0 : vector<24x256xf32>, vector<24x256xf32>, vector<24x256xf32> -> vector<72x256xf32>
    %22 = arith.truncf %21 : vector<72x256xf32> to vector<72x256xbf16>
    %c0_14 = arith.constant 0 : index
    %c0_15 = arith.constant 0 : index
    %23 = vector.load %arg3[%c0_14, %c0_15] : memref<256x128xbf16, #tpu.memory_space<vmem>>, vector<256x128xbf16>
    %cst = arith.constant dense<0.000000e+00> : vector<72x128xf32>
    %24 = tpu.matmul %22, %23, %cst {dimension_numbers = #tpu.dot_dimension_numbers<[1], [0], [0], [1], [0, 0, 1, 1], [], []>} : vector<72x256xbf16>, vector<256x128xbf16>, vector<72x128xf32> -> vector<72x128xf32>
    %cst_16 = arith.constant 0.0204081628 : f32
    %25 = vector.broadcast %cst_16 : f32 to vector<72x128xf32>
    %26 = arith.mulf %24, %25 : vector<72x128xf32>
    %27 = vector.extract_strided_slice %26 {offsets = [0, 0], sizes = [24, 128], strides = [1, 1]} : vector<72x128xf32> to vector<24x128xf32>
    %28 = vector.extract_strided_slice %26 {offsets = [24, 0], sizes = [24, 128], strides = [1, 1]} : vector<72x128xf32> to vector<24x128xf32>
    %29 = vector.extract_strided_slice %26 {offsets = [48, 0], sizes = [24, 128], strides = [1, 1]} : vector<72x128xf32> to vector<24x128xf32>
    %30 = arith.mulf %27, %27 : vector<24x128xf32>
    %31 = arith.mulf %28, %28 : vector<24x128xf32>
    %32 = arith.addf %30, %31 : vector<24x128xf32>
    %33 = math.sqrt %32 : vector<24x128xf32>
    %cst_17 = arith.constant 2.000000e+00 : f32
    %34 = vector.broadcast %cst_17 : f32 to vector<24x128xf32>
    %35 = arith.mulf %34, %33 : vector<24x128xf32>
    %cst_18 = arith.constant 9.99999993E-9 : f32
    %36 = vector.broadcast %cst_18 : f32 to vector<24x128xf32>
    %37 = arith.addf %35, %36 : vector<24x128xf32>
    %cst_19 = arith.constant 9.99999993E-9 : f32
    %38 = vector.broadcast %cst_19 : f32 to vector<24x128xf32>
    %39 = arith.addf %29, %38 : vector<24x128xf32>
    %40 = tpu.reciprocal %39 {approx = true} : vector<24x128xf32> -> vector<24x128xf32>
    %41 = arith.mulf %37, %40 : vector<24x128xf32>
    %c0_20 = arith.constant 0 : index
    %c0_21 = arith.constant 0 : index
    %42 = vector.load %arg4[%c0_20, %c0_21] : memref<1x128xf32, #tpu.memory_space<vmem>>, vector<1x128xf32>
    %43 = vector.broadcast %42 : vector<1x128xf32> to vector<24x128xf32>
    %44 = arith.mulf %41, %43 : vector<24x128xf32>
    %c0_22 = arith.constant 0 : index
    %c0_23 = arith.constant 0 : index
    %45 = vector.load %arg5[%c0_22, %c0_23] : memref<1x24xf32, #tpu.memory_space<vmem>>, vector<1x24xf32>
    %cst_24 = arith.constant dense<0.000000e+00> : vector<1x128xf32>
    %46 = tpu.matmul %45, %44, %cst_24 {dimension_numbers = #tpu.dot_dimension_numbers<[1], [0], [0], [1], [0, 0, 1, 1], [], []>} : vector<1x24xf32>, vector<24x128xf32>, vector<1x128xf32> -> vector<1x128xf32>
    %cst_25 = arith.constant dense<0.000000e+00> : vector<1xf32>
    %47 = vector.multi_reduction <add>, %46, %cst_25 [1] : vector<1x128xf32> to vector<1xf32>
    %48 = vector.shape_cast %47 : vector<1xf32> to vector<1x1xf32>
    %c0_26 = arith.constant 0 : index
    %c0_27 = arith.constant 0 : index
    %c0_28 = arith.constant 0 : index
    %49 = vector.load %arg6[%c0_26, %c0_27, %c0_28] : memref<1x1x1xf32, #tpu.memory_space<vmem>>, vector<1x1x1xf32>
    %50 = vector.shape_cast %49 : vector<1x1x1xf32> to vector<1x1xf32>
    %51 = vector.shape_cast %48 : vector<1x1xf32> to vector<1x1x1xf32>
    tpu.vector_store %arg6[%c0_26, %c0_27, %c0_28], %51 {strides = array<i32>} : memref<1x1x1xf32, #tpu.memory_space<vmem>>, vector<1x1x1xf32>,
    return
  }
  func.func @transform_0(%arg0: i32) -> (i32, i32, i32, i32) {
    %c0_i32 = arith.constant 0 : i32
    %c0_i32_0 = arith.constant 0 : i32
    %c0_i32_1 = arith.constant 0 : i32
    %c0_i32_2 = arith.constant 0 : i32
    return %arg0, %c0_i32, %c0_i32_0, %c0_i32_1 : i32, i32, i32, i32
  }
  func.func @transform_1(%arg0: i32) -> (i32, i32, i32, i32) {
    %c0_i32 = arith.constant 0 : i32
    %c0_i32_0 = arith.constant 0 : i32
    %c0_i32_1 = arith.constant 0 : i32
    %c0_i32_2 = arith.constant 0 : i32
    return %arg0, %c0_i32, %c0_i32_0, %c0_i32_1 : i32, i32, i32, i32
  }
  func.func @transform_2(%arg0: i32) -> (i32, i32) {
    %c0_i32 = arith.constant 0 : i32
    %c0_i32_0 = arith.constant 0 : i32
    %c0_i32_1 = arith.constant 0 : i32
    return %c0_i32, %c0_i32_0 : i32, i32
  }
  func.func @transform_3(%arg0: i32) -> (i32, i32) {
    %c0_i32 = arith.constant 0 : i32
    %c0_i32_0 = arith.constant 0 : i32
    %c0_i32_1 = arith.constant 0 : i32
    return %c0_i32, %c0_i32_0 : i32, i32
  }
  func.func @transform_4(%arg0: i32) -> (i32, i32) {
    %c0_i32 = arith.constant 0 : i32
    %c0_i32_0 = arith.constant 0 : i32
    %c0_i32_1 = arith.constant 0 : i32
    return %c0_i32, %c0_i32_0 : i32, i32
  }
  func.func @transform_5(%arg0: i32) -> (i32, i32, i32) {
    %c0_i32 = arith.constant 0 : i32
    %c0_i32_0 = arith.constant 0 : i32
    %c0_i32_1 = arith.constant 0 : i32
    return %arg0, %c0_i32, %c0_i32_0 : i32, i32, i32
  }
}

</mosaic_0001>

<bundles_post_ra>
// kernel: tpu_custom_call.1
= control target key start
LH: loop header
LB: loop body
LE: loop exit
PB: predicated region body
PF: predicated region fallthrough
CT: control target
= control target key end

     0   :  { %s1445_s0 = inlined_call_operand.hbm [shape: f32[2,2,24,256], index: 0, kind: input, shape index: {}]   ;;  %s1446_s1 = inlined_call_operand.hbm [shape: f32[2,2,24,256], index: 1, kind: input, shape index: {}]   ;;  %s1447_s2 = inlined_call_operand.hbm [shape: bf16[256,128], index: 2, kind: input, shape index: {}]   ;;  %s1448_s3 = inlined_call_operand.vmem [shape: f32[1,128], index: 3, kind: input, shape index: {}]   ;;  %s1449_s4 = inlined_call_operand.vmem [shape: f32[1,24], index: 4, kind: input, shape index: {}]   ;;  %s1450_s5 = inlined_call_operand.vmem [shape: f32[2,1,1], index: 5, kind: output, shape index: {}]  }
   0x1   :  { %1451 = sst [smem:[#allocation10_spill]] %s1447_s2 }
   0x2   :  { %10 = vsyncpa [#allocation3], 0 }
   0x3   :  { %12 = vsyncpa [#allocation3 + $0x1], 0 }
   0x4   :  { %13 = vsyncpa [#allocation5], 0 }
   0x5   :  { %15 = vsyncpa [#allocation5 + $0x1], 0  ;;  %s1172_s18 = smov 0   ;;  %s1174_s19 = smov 0  }
   0x6   :  { %s1176_s20 = smov 0   ;;  %s1178_s21 = smov 0  }
   0x7 LB: > { %s1191_s22 = sadd.s32 4294967295, %s1135_s21   ;;  %p41_p0 = scmp.ne.s32.totalorder %s1127_s19, %s1123_s18  ;;  %s1135_s21 = sphi %s1178_s21, %s1459_s21   ;;  %s1131_s20 = sphi %s1176_s20, %s1458_s20   ;;  %s1127_s19 = sphi %s1174_s19, %s1457_s19   ;;  %s1123_s18 = sphi %s1172_s18, %s1456_s18  }
   0x8   : > { %p42_p1 = scmp.eq.s32.totalorder %s1191_s22, 0  ;;  %p808_p2 = scmp.ge.s32.totalorder %s1135_s21, 1 }
   0x9   : > { %p167_p3 = scmp.lt.s32.totalorder %s1135_s21, 3  ;;  %s1453_s2 = sld [smem:[#allocation10_spill]] }
   0xa   : > { %p1199_p4 = por %p42_p1, %p41_p0  ;;  %s1137_s28 = smov [#allocation6]  }
   0xb   : > { %p1206_p5 = pnand %p808_p2, %p167_p3  ;;  %s180_s29 = sshll.u32 %s1137_s28, 4  ;;  %s181_s29 = int_to_ptr.vmem [resolvable:$true] %s180_s29 }
   0xc   : > { %s1215_s30 = sadd.s32 1, %s1135_s21   ;;  %s1138_s6 = smov 64  }
   0xd   : > { %p939_p6 = pneg %p1206_p5  ;;  %s1139_s7 = smov 4  }
   0xe   : > { %s25_s8 = ssub.s32 %s1135_s21, %s1215_s30  ;;  %s28_s9 = sadd.s32 1, %s1131_s20 }
   0xf   : > { %s178_s26 = sshll.u32 %s1453_s2, 4  ;;  %p940_p7 = pnand %p939_p6, %p42_p1  ;;  %s179_s26 = int_to_ptr.hbm [resolvable:$true] %s178_s26 }
  0x10   : > { %p26_p8 = scmp.eq.s32.totalorder %s25_s8, 0  ;;  %p35_p9 = scmp.ne.s32.totalorder %s1131_s20, %s1127_s19 }
  0x11   : > { %942 = dma.hbm_to_vmem [thread:$0]  (!%p940_p7), %s179_s26, 2048, %s181_s29, [#allocation5], %s1138_s6, %s1138_s6, %s1139_s7  }
  0x12   : > { %p36_p10 = scmp.eq.s32.totalorder %s1135_s21, 0  ;;  %p951_p11 = scmp.lt.s32.totalorder %s1135_s21, 2 }
  0x13   : > { %s1225_s10 = scalar_select %p26_p8, %s1131_s20, %s28_s9  }
  0x14   : > { %p37_p12 = por %p36_p10, %p35_p9  ;;  %s200_s11 = sand.u32 1, %s1131_s20  }
  0x15   : > { %s1228_s12 = smul.u32 96, %s200_s11  ;;  %s222_s26 = sand.u32 1, %s1135_s21  }
  0x16   : > { %s927_s13 = smul.u32 96, %s1135_s21  ;;  %p1231_p13 = pnand %p951_p11, %p37_p12 }
  0x17   : > { %s204_s18 = scalar_lea.vmem [#allocation2], %s1228_s12  ;;  %s201_s28 = scalar_lea.sflag [#allocation3], %s200_s11 }
  0x18   : > { %s209_s17 = scalar_lea.hbm %s1445_s0, %s927_s13  ;;  %s212_s24 = sshll.u32 %s204_s18, 4  ;;  %s213_s24 = int_to_ptr.vmem [resolvable:$true] %s212_s24 }
  0x19   : > { %s210_s25 = sshll.u32 %s209_s17, 4  ;;  %p1037_p2 = pneg %p1231_p13  ;;  %s211_s25 = int_to_ptr.hbm [resolvable:$true] %s210_s25 }
  0x1a   : > { %s1033_s29 = sshra.s32 %s211_s25, 4  ;;  %s1040_s9 = scalar_lea.hbm %s1445_s0, 192  ;;  %s1034_s29 = int_to_ptr.hbm [resolvable:$true] %s1033_s29 }
  0x1b   : > { %s1035_s6 = scalar_lea.hbm %s1034_s29, 96  ;;  %p1041_p7 = scmp.lt.s32.totalorder %s1034_s29, %s1445_s0 }
  0x1c   : > { %p1036_p0 = scmp.ne.s32.totalorder %s1034_s29, %s1035_s6  ;;  %p1042_p8 = scmp.lt.s32.totalorder %s1040_s9, %s1035_s6 }
  0x1e   : > { %p1038_p3 = pnand %p1037_p2, %p1036_p0  ;;  %p1043_p9 = por %p1042_p8, %p1041_p7 }
  0x20   : > { %p1039_p6 = pneg %p1038_p3 }
  0x22   : > { %p1044_p10 = pnand %p1043_p9, %p1039_p6 }
  0x24   : > { %1047 = shalt.err (!%p1044_p10)
}
  0x25   : > { %s1140_s11 = smov 256   ;;  %s1141_s17 = smov 16  }
  0x26   : > { %946 = dma.hbm_to_vmem [thread:$0]  (!%p1231_p13), %s211_s25, 1536, %s213_s24, %s201_s28, %s1140_s11, %s1140_s11, %s1141_s17  }
  0x27   : > { %s231_s8 = scalar_lea.hbm %s1446_s1, %s927_s13  ;;  %s226_s2 = scalar_lea.vmem [#allocation4], %s1228_s12 }
  0x28   : > { %s234_s15 = sshll.u32 %s226_s2, 4  ;;  %s232_s29 = sshll.u32 %s231_s8, 4  ;;  %s235_s15 = int_to_ptr.vmem [resolvable:$true] %s234_s15  ;;  %s233_s29 = int_to_ptr.hbm [resolvable:$true] %s232_s29 }
  0x29   : > { %s223_s6 = scalar_lea.sflag [#allocation5], %s222_s26  ;;  %s1063_s9 = sshra.s32 %s233_s29, 4  ;;  %s1064_s9 = int_to_ptr.hbm [resolvable:$true] %s1063_s9 }
  0x2a   : > { %s1065_s16 = scalar_lea.hbm %s1064_s9, 96  ;;  %s1070_s25 = scalar_lea.hbm %s1446_s1, 192 }
  0x2b   : > { %p1066_p11 = scmp.ne.s32.totalorder %s1064_s9, %s1065_s16  ;;  %p1071_p3 = scmp.lt.s32.totalorder %s1064_s9, %s1446_s1 }
  0x2c   : > { %p1072_p6 = scmp.lt.s32.totalorder %s1070_s25, %s1065_s16 }
  0x2d   : > { %p1068_p12 = pnand %p1066_p11, %p1037_p2 }
  0x2e   : > { %p1073_p7 = por %p1072_p6, %p1071_p3 }
  0x2f   : > { %p1069_p0 = pneg %p1068_p12 }
  0x31   : > { %p1074_p8 = pnand %p1073_p7, %p1069_p0 }
  0x33   : > { %1077 = shalt.err (!%p1074_p8)
}
  0x34   : > { %949 = dma.hbm_to_vmem [thread:$0]  (!%p1231_p13), %s233_s29, 1536, %s235_s15, %s223_s6, %s1140_s11, %s1140_s11, %s1141_s17  }
  0x35   : > { %246 = sbr.rel (%p1206_p5) target bundleno = 555 (0x22b), region = 40  ;;  %s248_s2 = sand.u32 (!%p1206_p5), 1, %s1127_s19  }
  0x36   : > { %s930_s12 = smul.u32 (!%p1206_p5), 96, %s248_s2  ;;  %s249_s26 = scalar_lea.sflag (!%p1206_p5), [#allocation3], %s248_s2 }
  0x38   : > { %s1275_s18 = scalar_lea.vmem (!%p1206_p5), [#allocation2], %s930_s12 }
  0x3a   : > { %1110 = dma.done.wait (%p1199_p4), %s249_s26, 1536  }
  0x3b   : > { %1112 = vsyncadd (%p1199_p4), %s249_s26, 4294965760  ;;  %s258_s7 = sand.u32 1, %s1191_s22   ;;  %s1282_s11 = scalar_lea.vmem [#allocation4], %s930_s12 }
  0x3c   : > { %s259_s14 = scalar_lea.sflag [#allocation5], %s258_s7 }
  0x3d   : > { %1114 = dma.done.wait (%p1199_p4), %s259_s14, 1536  }
  0x3e   : > { %1116 = vsyncadd (%p1199_p4), %s259_s14, 4294965760 }
  0x3f   : > { %1118 = dma.done.wait (%p42_p1), [#allocation5], 2048  }
  0x40   : > { %1120 = vsyncadd (%p42_p1), [#allocation5], 4294965248  ;;  %v901_v0 = vld [vmem:[#allocation6 + $0x38] sm:$0xff]  ;;  %v900_v2 = vld [vmem:[#allocation6 + $0x30] sm:$0xff]  ;;  %vm686_vm6 = vcmask 195584   ;;  %vm710_vm7 = vcmask 1040384  }
  0x41   : > { %v909_v1 = vld [vmem:[#allocation6 + $0x78] sm:$0xff]  ;;  %543 = vmatpush.bf16.msra.mxu0 %v901_v0  ;;  %v908_v3 = vld [vmem:[#allocation6 + $0x70] sm:$0xff]  ;;  %910 = vmatpush.bf16.msra.mxu3 %v901_v0  ;;  %v899_v4 = vld [vmem:[#allocation6 + $0x28] sm:$0xff]  ;;  %p298_p1 = scmp.lt.s32.totalorder %s1191_s22, 1  ;;  %vm714_vm8 = vcmask 0  }
  0x42   : > { %576 = vmatpush.bf16.msra.mxu1 %v909_v1  ;;  %918 = vmatpush.bf16.msra.mxu2 %v909_v1  ;;  %v907_v5 = vld [vmem:[#allocation6 + $0x68] sm:$0xff]  ;;  %v898_v6 = vld [vmem:[#allocation6 + $0x20] sm:$0xff]  ;;  %v1296_v9 = vld [vmem:[%s1275_s18 + $0x10] sm:$0xff] }
  0x43   : > { %v906_v7 = vld [vmem:[#allocation6 + $0x60] sm:$0xff]  ;;  %v1299_v10 = vld [vmem:[%s1275_s18 + $0x30] sm:$0xff]  ;;  %v1317_v16 = vld [vmem:[%s1275_s18 + $0x8] sm:$0xff]  ;;  %v365_v34 = vmul.f32 %v1296_v9, %v1296_v9  ;;  %s1461_s22 = smov (!%p298_p1, %s1191_s22), 1 }
  0x44   : > { %v1293_v8 = vld [vmem:[%s1275_s18] sm:$0xff]  ;;  %v1305_v12 = vld [vmem:[%s1282_s11 + $0x10] sm:$0xff]  ;;  %v1320_v17 = vld [vmem:[%s1275_s18 + $0x18] sm:$0xff]  ;;  %v369_v35 = vmul.f32 %v1299_v10, %v1299_v10  ;;  %v364_v46 = vmul.f32 %v1317_v16, %v1317_v16  ;;  %s300_s6 = scalar_lea.vmem %s1450_s5, %s1461_s22 }
  0x45   : > { %544 = vmatpush.bf16.msra.mxu0 %v900_v2  ;;  %911 = vmatpush.bf16.msra.mxu3 %v900_v2  ;;  %v1302_v11 = vld [vmem:[%s1282_s11] sm:$0xff]  ;;  %v1311_v14 = vld [vmem:[%s1282_s11 + $0x30] sm:$0xff]  ;;  %v1323_v18 = vld [vmem:[%s1275_s18 + $0x38] sm:$0xff]  ;;  %v329_v25 = vmul.f32 %v1305_v12, %v1296_v9  ;;  %v363_v33 = vmul.f32 %v1293_v8, %v1293_v8  ;;  %v383_v41 = vmul.f32 %v1305_v12, %v1305_v12 }
  0x46   : > { %577 = vmatpush.bf16.msra.mxu1 %v908_v3  ;;  %919 = vmatpush.bf16.msra.mxu2 %v908_v3  ;;  %v1308_v13 = vld [vmem:[%s1275_s18 + $0x40] sm:$0xff]  ;;  %v1326_v19 = vld [vmem:[%s1282_s11 + $0x8] sm:$0xff]  ;;  %v1329_v20 = vld [vmem:[%s1282_s11 + $0x18] sm:$0xff]  ;;  %v327_v24 = vmul.f32 %v1302_v11, %v1293_v8  ;;  %v333_v26 = vmul.f32 %v1311_v14, %v1299_v10  ;;  %v381_v40 = vmul.f32 %v1302_v11, %v1302_v11 }
  0x47   : > { %v1314_v15 = vld [vmem:[%s1282_s11 + $0x40] sm:$0xff]  ;;  %v1332_v21 = vld [vmem:[%s1282_s11 + $0x38] sm:$0xff]  ;;  %v1341_v27 = vld [vmem:[%s1275_s18 + $0x48] sm:$0xff]  ;;  %v328_v30 = vmul.f32 %v1326_v19, %v1317_v16  ;;  %v330_v31 = vmul.f32 %v1329_v20, %v1320_v17  ;;  %v371_v36 = vmul.f32 %v1308_v13, %v1308_v13  ;;  %v375_v42 = vadd.f32 %v369_v35, %v363_v33 }
  0x48   : > { %v897_v22 = vld [vmem:[#allocation6 + $0x18] sm:$0xff]  ;;  %v1344_v28 = vld [vmem:[%s1282_s11 + $0x48] sm:$0xff]  ;;  %v335_v29 = vmul.f32 %v1314_v15, %v1308_v13  ;;  %v334_v32 = vmul.f32 %v1332_v21, %v1323_v18  ;;  %v896_v37 = vld [vmem:[#allocation6 + $0x10] sm:$0xff]  ;;  %v393_v44 = vmul.f32 %v1311_v14, %v1311_v14  ;;  %v395_v45 = vmul.f32 %v1314_v15, %v1314_v15 }
  0x49   : > { %545 = vmatpush.bf16.msra.mxu0 %v899_v4  ;;  %912 = vmatpush.bf16.msra.mxu3 %v899_v4  ;;  %v905_v23 = vld [vmem:[#allocation6 + $0x58] sm:$0xff]  ;;  %v904_v38 = vld [vmem:[#allocation6 + $0x50] sm:$0xff]  ;;  %v336_v39 = vmul.f32 %v1344_v28, %v1341_v27  ;;  %v377_v43 = vadd.f32 %v371_v36, %v365_v34  ;;  %v366_v47 = vmul.f32 %v1320_v17, %v1320_v17  ;;  %v895_v53 = vld [vmem:[#allocation6 + $0x8] sm:$0xff] }
  0x4a   : > { %578 = vmatpush.bf16.msra.mxu1 %v907_v5  ;;  %920 = vmatpush.bf16.msra.mxu2 %v907_v5  ;;  %v370_v48 = vmul.f32 %v1323_v18, %v1323_v18  ;;  %v387_v49 = vadd.f32 %v381_v40, %v375_v42  ;;  %v372_v51 = vmul.f32 %v1341_v27, %v1341_v27  ;;  %v903_v54 = vld [vmem:[#allocation6 + $0x48] sm:$0xff]  ;;  %v894_v2 = vld [vmem:[#allocation6] sm:$0xff]  ;;  %v820_v33 = vld [vmem:[%s1275_s18 + $0x58] sm:$0xff] }
  0x4b   : > { %v389_v50 = vadd.f32 %v383_v41, %v377_v43  ;;  %v382_v52 = vmul.f32 %v1326_v19, %v1326_v19  ;;  %v384_v56 = vmul.f32 %v1329_v20, %v1329_v20  ;;  %v394_v57 = vmul.f32 %v1332_v21, %v1332_v21  ;;  %v902_v3 = vld [vmem:[#allocation6 + $0x40] sm:$0xff]  ;;  %v319_v36 = vld [vmem:[%s1282_s11 + $0x28] sm:$0xff] }
  0x4c   : > { %v376_v55 = vadd.f32 %v370_v48, %v364_v46  ;;  %v378_v58 = vadd.f32 %v372_v51, %v366_v47  ;;  %v339_v59 = vadd.f32 %v333_v26, %v327_v24  ;;  %v396_v61 = vmul.f32 %v1344_v28, %v1344_v28  ;;  %v305_v26 = vld [vmem:[%s1275_s18 + $0x20] sm:$0xff] }
  0x4d   : > { %546 = vmatpush.bf16.msra.mxu0 %v898_v6  ;;  %913 = vmatpush.bf16.msra.mxu3 %v898_v6  ;;  %v341_v62 = vadd.f32 %v335_v29, %v329_v25  ;;  %v340_v63 = vadd.f32 %v334_v32, %v328_v30  ;;  %v342_v0 = vadd.f32 %v336_v39, %v330_v31  ;;  %v819_v29 = vld [vmem:[%s1275_s18 + $0x50] sm:$0xff]  ;;  %v318_v30 = vld [vmem:[%s1282_s11 + $0x20] sm:$0xff]  ;;  %v306_v32 = vld [vmem:[%s1275_s18 + $0x28] sm:$0xff] }
  0x4e   : > { %579 = vmatpush.bf16.msra.mxu1 %v906_v7  ;;  %921 = vmatpush.bf16.msra.mxu2 %v906_v7  ;;  %v388_v60 = vadd.f32 %v382_v52, %v376_v55  ;;  %v390_v1 = vadd.f32 %v384_v56, %v378_v58  ;;  %v399_v4 = vadd.f32 %v393_v44, %v387_v49  ;;  %v825_v31 = vld [vmem:[%s1282_s11 + $0x50] sm:$0xff] }
  0x4f   : > { %v401_v5 = vadd.f32 %v395_v45, %v389_v50  ;;  %v367_v34 = vmul.f32 %v305_v26, %v305_v26  ;;  %v373_v35 = vmul.f32 %v819_v29, %v819_v29  ;;  %v368_v39 = vmul.f32 %v306_v32, %v306_v32 }
  0x50   : > { %v400_v6 = vadd.f32 %v394_v57, %v388_v60  ;;  %v402_v7 = vadd.f32 %v396_v61, %v390_v1  ;;  %v374_v40 = vmul.f32 %v820_v33, %v820_v33  ;;  %v345_v41 = vmul.f32 %v1299_v10, %v1302_v11 }
  0x51   : > { %547 = vmatpush.bf16.msra.mxu0 %v897_v22  ;;  %914 = vmatpush.bf16.msra.mxu3 %v897_v22  ;;  %v405_v22 = vpack.c.bf16 %v341_v62, %v339_v59  ;;  %v411_v24 = vpack.c.bf16 %v401_v5, %v399_v4  ;;  %v379_v42 = vadd.f32 %v373_v35, %v367_v34 }
  0x52   : > { %580 = vmatpush.bf16.msra.mxu1 %v905_v23  ;;  %922 = vmatpush.bf16.msra.mxu2 %v905_v23  ;;  %v406_v23 = vpack.c.bf16 %v342_v0, %v340_v63  ;;  %v412_v25 = vpack.c.bf16 %v402_v7, %v400_v6  ;;  %v386_v43 = vmul.f32 %v319_v36, %v319_v36 }
  0x53   : > { %v331_v44 = vmul.f32 %v318_v30, %v305_v26  ;;  %v337_v45 = vmul.f32 %v825_v31, %v819_v29  ;;  %v351_v46 = vmul.f32 %v1311_v14, %v1293_v8  ;;  %v380_v47 = vadd.f32 %v374_v40, %v368_v39 }
  0x54   : > { %v332_v48 = vmul.f32 %v319_v36, %v306_v32  ;;  %v346_v50 = vmul.f32 %v1323_v18, %v1326_v19  ;;  %v352_v51 = vmul.f32 %v1332_v21, %v1317_v16  ;;  %v347_v16 = vmul.f32 %v1308_v13, %v1305_v12 }
  0x55   : > { %548 = vmatpush.bf16.msra.mxu0 %v896_v37  ;;  %915 = vmatpush.bf16.msra.mxu3 %v896_v37  ;;  %v826_v37 = vld [vmem:[%s1282_s11 + $0x58] sm:$0xff]  ;;  %v343_v11 = vadd.f32 %v337_v45, %v331_v44  ;;  %v357_v55 = vsub.f32 %v345_v41, %v351_v46  ;;  %v349_v18 = vmul.f32 %v819_v29, %v318_v30 }
  0x56   : > { %581 = vmatpush.bf16.msra.mxu1 %v904_v38  ;;  %923 = vmatpush.bf16.msra.mxu2 %v904_v38  ;;  %v385_v38 = vmul.f32 %v318_v30, %v318_v30  ;;  %v338_v49 = vmul.f32 %v826_v37, %v820_v33  ;;  %v398_v10 = vmul.f32 %v826_v37, %v826_v37 }
  0x57   : > { %v358_v57 = vsub.f32 %v346_v50, %v352_v51  ;;  %v407_v8 = vpack.c.bf16 %v357_v55, %v343_v11  ;;  %v353_v19 = vmul.f32 %v1314_v15, %v1296_v9  ;;  %v355_v21 = vmul.f32 %v825_v31, %v305_v26 }
  0x58   : > { %v391_v52 = vadd.f32 %v385_v38, %v379_v42  ;;  %v344_v56 = vadd.f32 %v338_v49, %v332_v48  ;;  %v348_v62 = vmul.f32 %v1341_v27, %v1329_v20  ;;  %v350_v63 = vmul.f32 %v820_v33, %v319_v36 }
  0x59   : > { %549 = vmatpush.bf16.msra.mxu0 %v895_v53  ;;  %916 = vmatpush.bf16.msra.mxu3 %v895_v53  ;;  %v397_v53 = vmul.f32 %v825_v31, %v825_v31  ;;  %v354_v0 = vmul.f32 %v1344_v28, %v1320_v17  ;;  %v356_v1 = vmul.f32 %v826_v37, %v306_v32 }
  0x5a   : > { %582 = vmatpush.bf16.msra.mxu1 %v903_v54  ;;  %924 = vmatpush.bf16.msra.mxu2 %v903_v54  ;;  %v392_v54 = vadd.f32 %v386_v43, %v380_v47  ;;  %v408_v14 = vpack.c.bf16 %v358_v57, %v344_v56 }
  0x5b   : > { %v403_v58 = vadd.f32 %v397_v53, %v391_v52  ;;  %v360_v4 = vsub.f32 %v348_v62, %v354_v0  ;;  %v362_v5 = vsub.f32 %v350_v63, %v356_v1 }
  0x5c   : > { %v404_v59 = vadd.f32 %v398_v10, %v392_v54 }
  0x5d   : > { %550 = vmatpush.bf16.msra.mxu0 %v894_v2  ;;  %917 = vmatpush.bf16.msra.mxu3 %v894_v2  ;;  %v413_v60 = vpack.c.bf16 %v403_v58, %v403_v58  ;;  %v359_v2 = vsub.f32 %v347_v16, %v353_v19  ;;  %v410_v7 = vpack.c.bf16 %v362_v5, %v360_v4 }
  0x5e   : > { %583 = vmatpush.bf16.msra.mxu1 %v902_v3  ;;  %925 = vmatpush.bf16.msra.mxu2 %v902_v3  ;;  %v414_v61 = vpack.c.bf16 %v404_v59, %v404_v59  ;;  %v361_v3 = vsub.f32 %v349_v18, %v355_v21 }
  0x60   : > { %551 = vmatmul.bf16.vlgmr.msra.gmra.mxu0 %v405_v22  ;;  %566 = vmatmul.bf16.vlgmr.msra.gmra.mxu3 %v411_v24  ;;  %v409_v6 = vpack.c.bf16 %v361_v3, %v359_v2 }
  0x61   : > { %584 = vmatmul.bf16.vlgmr.msra.gmra.mxu1 %v406_v23  ;;  %599 = vmatmul.bf16.vlgmr.msra.gmra.mxu2 %v412_v25 }
  0x70   : > { %556 = vmatmul.bf16.gmra.mxu0 %v407_v8  ;;  %571 = vmatmul.bf16.gmra.mxu3 %v413_v60 }
  0x71   : > { %589 = vmatmul.bf16.gmra.mxu1 %v408_v14  ;;  %604 = vmatmul.bf16.gmra.mxu2 %v414_v61 }
  0x80   : > { %561 = vmatmul.bf16.gmra.mxu0 %v409_v6 }
  0x81   : > { %594 = vmatmul.bf16.gmra.mxu1 %v410_v7 }
  0xdd   : > { %v552_v12 = vpop.f32.mrf.mxu0 }
  0xde   : > { %v585_v13 = vpop.f32.mrf.mxu1 }
  0xdf   : > { %v586_v17 = vadd.f32 %v585_v13, %v552_v12 }
  0xe1   : > { %v609_v31 = vmul.f32 0.020408163, %v586_v17 }
  0xe3   : > { %v567_v9 = vpop.f32.mrf.mxu3  ;;  %v618_v34 = vmul.f32 %v609_v31, %v609_v31 }
  0xe4   : > { %v600_v15 = vpop.f32.mrf.mxu2 }
  0xe5   : > { %v554_v22 = vpop.f32.mrf.mxu0  ;;  %v601_v18 = vadd.f32 %v600_v15, %v567_v9 }
  0xe6   : > { %v587_v23 = vpop.f32.mrf.mxu1 }
  0xe7   : > { %v588_v35 = vadd.f32 %v587_v23, %v554_v22  ;;  %v615_v3 = vmul.f32 0.020408163, %v601_v18 }
  0xe9   : > { %v610_v42 = vmul.f32 0.020408163, %v588_v35  ;;  %v669_v9 = vadd.f32 1e-08, %v615_v3 }
  0xeb   : > { %v569_v20 = vpop.f32.mrf.mxu3  ;;  %v619_v45 = vmul.f32 %v610_v42, %v610_v42  ;;  %v990_v42 = vld [vmem:[%s1448_s3] ss:$0 sm:$0xff] }
  0xec   : > { %v602_v27 = vpop.f32.mrf.mxu2 }
  0xed   : > { %v557_v24 = vpop.f32.mrf.mxu0  ;;  %v603_v63 = vadd.f32 %v602_v27, %v569_v20 }
  0xee   : > { %v590_v25 = vpop.f32.mrf.mxu1 }
  0xef   : > { %v591_v46 = vadd.f32 %v590_v25, %v557_v24  ;;  %v616_v7 = vmul.f32 0.020408163, %v603_v63 }
  0xf1   : > { %v611_v53 = vmul.f32 0.020408163, %v591_v46  ;;  %v670_v27 = vadd.f32 1e-08, %v616_v7 }
  0xf3   : > { %v572_v28 = vpop.f32.mrf.mxu3  ;;  %v620_v55 = vmul.f32 %v611_v53, %v611_v53 }
  0xf4   : > { %v605_v26 = vpop.f32.mrf.mxu2 }
  0xf5   : > { %v559_v29 = vpop.f32.mrf.mxu0  ;;  %v606_v16 = vadd.f32 %v605_v26, %v572_v28 }
  0xf6   : > { %v592_v30 = vpop.f32.mrf.mxu1 }
  0xf7   : > { %v593_v32 = vadd.f32 %v592_v30, %v559_v29  ;;  %v617_v2 = vmul.f32 0.020408163, %v606_v16 }
  0xf9   : > { %v612_v33 = vmul.f32 0.020408163, %v593_v32  ;;  %v671_v22 = vadd.f32 1e-08, %v617_v2 }
  0xfb   : > { %v621_v36 = vmul.f32 %v612_v33, %v612_v33  ;;  %v574_v38 = vpop.f32.mrf.mxu3 }
  0xfc   : > { %v607_v39 = vpop.f32.mrf.mxu2 }
  0xfd   : > { %v1412_v37 = vadd.f32 %v621_v36, %v618_v34  ;;  %v562_v40 = vpop.f32.mrf.mxu0 }
  0xfe   : > { %v595_v41 = vpop.f32.mrf.mxu1 }
  0xff   : > { %991 = vrsqrt.f32 %v1412_v37  ;;  %v596_v43 = vadd.f32 %v595_v41, %v562_v40  ;;  %vm634_vm1 = vcmp.eq.f32.partialorder %v1412_v37, inf  ;;  %v637_v25 = vand.u32 2147483648, %v1412_v37 }
 0x100   : > { %vm636_vm3 = vcmp.eq.f32.partialorder %v1412_v37, 0.0 }
 0x101   : > { %v613_v44 = vmul.f32 0.020408163, %v596_v43 }
 0x103   : > { %v622_v47 = vmul.f32 %v613_v44, %v613_v44 }
 0x105   : > { %v992_v48 = vpop.eup %991  ;;  %v625_v49 = vadd.f32 %v622_v47, %v619_v45  ;;  %v564_v50 = vpop.f32.mrf.mxu0 }
 0x106   : > { %v597_v51 = vpop.f32.mrf.mxu1  ;;  %v628_v52 = vmul.f32 %v992_v48, %v1412_v37 }
 0x107   : > { %993 = vrsqrt.f32 %v625_v49  ;;  %v598_v54 = vadd.f32 %v597_v51, %v564_v50  ;;  %vm646_vm0 = vcmp.eq.f32.partialorder %v625_v49, inf  ;;  %v649_v23 = vand.u32 2147483648, %v625_v49 }
 0x108   : > { %v629_v10 = vmul.f32 %v992_v48, %v628_v52  ;;  %vm648_vm2 = vcmp.eq.f32.partialorder %v625_v49, 0.0 }
 0x109   : > { %v614_v11 = vmul.f32 0.020408163, %v598_v54 }
 0x10a   : > { %v630_v57 = vmul.f32 0.5, %v629_v10 }
 0x10b   : > { %v623_v56 = vmul.f32 %v614_v11, %v614_v11 }
 0x10c   : > { %v631_v60 = vsub.f32 1.5, %v630_v57 }
 0x10d   : > { %v994_v58 = vpop.eup %993  ;;  %v626_v59 = vadd.f32 %v623_v56, %v620_v55 }
 0x10e   : > { %v640_v8 = vmul.f32 %v994_v58, %v625_v49  ;;  %v632_v21 = vmul.f32 %v992_v48, %v631_v60  ;;  %v685_v48 = vld [vmem:[%s1449_s4] sm:$0x1] }
 0x10f   : > { %995 = vrsqrt.f32 %v626_v59  ;;  %vm658_vm4 = vcmp.eq.f32.partialorder %v626_v59, inf  ;;  %v661_v30 = vand.u32 2147483648, %v626_v59  ;;  %vm660_vm5 = vcmp.eq.f32.partialorder %v626_v59, 0.0 }
 0x110   : > { %v641_v14 = vmul.f32 %v994_v58, %v640_v8  ;;  %v633_v6 = vmul.f32 %v632_v21, %v1412_v37  ;;  %997 = vrcp.f32 %v671_v22 }
 0x111   : > { %999 = vrcp.f32 %v669_v9 }
 0x112   : > { %v642_v61 = vmul.f32 0.5, %v641_v14  ;;  %v635_v20 = vsel %vm634_vm1, %v1412_v37, %v633_v6  ;;  %1001 = vrcp.f32 %v670_v27 }
 0x113   : > { %v638_v28 = vsel %vm636_vm3, %v637_v25, %v635_v20 }
 0x114   : > { %v643_v19 = vsub.f32 1.5, %v642_v61  ;;  %v663_v32 = vmul.f32 2.0, %v638_v28 }
 0x115   : > { %v996_v62 = vpop.eup %995 }
 0x116   : > { %v652_v0 = vmul.f32 %v996_v62, %v626_v59  ;;  %v644_v1 = vmul.f32 %v994_v58, %v643_v19  ;;  %v998_v36 = vpop.eup %997  ;;  %v666_v40 = vadd.f32 1e-08, %v663_v32 }
 0x117   : > { %v1000_v38 = vpop.eup %999 }
 0x118   : > { %v653_v4 = vmul.f32 %v996_v62, %v652_v0  ;;  %v645_v5 = vmul.f32 %v644_v1, %v625_v49  ;;  %v1002_v41 = vpop.eup %1001  ;;  %v675_v45 = vmul.f32 %v1000_v38, %v666_v40 }
 0x11a   : > { %v654_v12 = vmul.f32 0.5, %v653_v4  ;;  %v647_v13 = vsel %vm646_vm0, %v625_v49, %v645_v5  ;;  %v682_v47 = vmul.f32 %v990_v42, %v675_v45 }
 0x11b   : > { %v650_v24 = vsel %vm648_vm2, %v649_v23, %v647_v13 }
 0x11c   : > { %v655_v15 = vsub.f32 1.5, %v654_v12  ;;  %v664_v29 = vmul.f32 2.0, %v650_v24 }
 0x11e   : > { %v656_v17 = vmul.f32 %v996_v62, %v655_v15  ;;  %v667_v35 = vadd.f32 1e-08, %v664_v29 }
 0x120   : > { %v657_v26 = vmul.f32 %v656_v17, %v626_v59  ;;  %v676_v43 = vmul.f32 %v1002_v41, %v667_v35 }
 0x122   : > { %v659_v31 = vsel %vm658_vm4, %v626_v59, %v657_v26  ;;  %v683_v46 = vmul.f32 %v990_v42, %v676_v43 }
 0x123   : > { %v662_v33 = vsel %vm660_vm5, %v661_v30, %v659_v31 }
 0x124   : > { %v665_v34 = vmul.f32 2.0, %v662_v33 }
 0x126   : > { %v668_v39 = vadd.f32 1e-08, %v665_v34 }
 0x128   : > { %v677_v37 = vmul.f32 %v998_v36, %v668_v39 }
 0x12a   : > { %v684_v44 = vmul.f32 %v990_v42, %v677_v37 }
 0x12c   : > { %703 = vmatpush.msrb.mxu2 %v684_v44 }
 0x12e   : > { %704 = vmatpush.msrb.mxu2 %v683_v46 }
 0x130   : > { %705 = vmatpush.msrb.mxu2 %v682_v47 }
 0x131   : > { %891 = vmatmul.msk.f32.vlgmr.msrb.gmra.mxu2 %vm686_vm6, %v685_v48 }
 0x1b4   : > { %v707_v49 = vpop.f32.mrf.mxu2 }
 0x1b5   : > { %v711_v50 = vsel %vm710_vm7, %v707_v49, 0.0 }
 0x1b6   : > { %712 = vadd.xlane.f32.xlu0 %v711_v50 }
 0x229   : > { %v713_v51 = vpop.xlane.xlu0 %712 }
 0x22a   : > { %715 = vst.msk [vmem:[%s300_s6] sm:$0x1] %vm714_vm8, %v713_v51 }
 0x22b PF: > { %p18_p4 = scmp.ge.s32.totalorder %s1215_s30, 4   ;;  %s1456_s18 = smov %s1127_s19 }
 0x22c   : > { %s1457_s19 = smov %s1131_s20  ;;  %s1458_s20 = smov %s1225_s10 }
 0x22d   : > { %s1459_s21 = smov %s1215_s30  ;;  %20 = sbr.rel (!%p18_p4) target bundleno = 7 (0x7), region = 99 }
 0x232   :  { %733 = vsyncpa [#allocation3], 1 }
 0x233   :  { %735 = vsyncpa [#allocation3 + $0x1], 1 }
 0x234   :  { %736 = vsyncpa [#allocation5], 1 }
 0x235   :  { %738 = vsyncpa [#allocation5 + $0x1], 1 }

</bundles_post_ra>
